<compile_context>
chip_gen: v5e
topology: v5e:2x2
jax: 0.10.0
libtpu: 0.0.40
codegen_flags: <defaults>
</compile_context>

<pallas_src>
import functools

import jax
import jax.numpy as jnp
from jax import lax
from jax.experimental import pallas as pl
from jax.experimental.pallas import tpu as pltpu

_EPS = 1e-8  # matches torch.nn.CosineSimilarity default eps


def _round_up(n, m):
    return ((n + m - 1) // m) * m


def _similarity_kernel(x_ref, y_ref, o_ref, *, inv_temp):
    # x_ref: (TM, H), y_ref: (TN, H), o_ref: (TM, TN)
    x = x_ref[...]
    y = y_ref[...]

    # Row sum-of-squares in f32 (cast per-element; keeps bf16 inputs exact
    # enough for large H).
    xf = x.astype(jnp.float32)
    yf = y.astype(jnp.float32)
    ssq_x = jnp.sum(xf * xf, axis=-1, keepdims=True)  # (TM, 1)
    ssq_y = jnp.sum(yf * yf, axis=-1, keepdims=True)  # (TN, 1)

    # 1 / max(||x||, eps) via rsqrt (EUP); fold 1/temp into the x scale so
    # the temperature never shows up as a separate (TM, TN) multiply.
    # TODO(synk): temp is baked in as a static Python float; pass it via an
    # SMEM scalar if it ever becomes a traced/learnable tensor.
    inv_x = lax.rsqrt(jnp.maximum(ssq_x, _EPS * _EPS)) * inv_temp  # (TM, 1)
    inv_y = lax.rsqrt(jnp.maximum(ssq_y, _EPS * _EPS))             # (TN, 1)

    # Transposed-RHS contraction: contract last dim of both operands on the
    # MXU, accumulate in f32.  No materialized transpose of y.
    sim = lax.dot_general(
        x, y,
        dimension_numbers=(((1,), (1,)), ((), ())),
        preferred_element_type=jnp.float32,
    )  # (TM, TN)

    # Post-scale the f32 accumulator by the row/col inverse norms.
    o_ref[...] = ((sim * inv_x) * inv_y.reshape(1, -1)).astype(o_ref.dtype)


def similarity_matrix(x2d, y2d, temp, *, tm_max=256, tn_max=256):
    """Cosine-similarity matrix / temp for x2d:(Bx,H), y2d:(By,H) -> (Bx,By) f32."""
    bx, h = x2d.shape
    by, h2 = y2d.shape
    assert h == h2, "hidden dims must match"

    # Lane-dense, MXU-friendly tiles: TM multiple of 8, TN multiple of 128.
    tm = min(tm_max, _round_up(bx, 8))
    tn = min(tn_max, _round_up(by, 128))
    bx_p = _round_up(bx, tm)
    by_p = _round_up(by, tn)

    # Zero-pad batch dims; padded rows have sim == 0 and are sliced off below.
    if bx_p != bx:
        x2d = jnp.pad(x2d, ((0, bx_p - bx), (0, 0)))
    if by_p != by:
        y2d = jnp.pad(y2d, ((0, by_p - by), (0, 0)))

    grid = (bx_p // tm, by_p // tn)
    kernel = functools.partial(_similarity_kernel, inv_temp=float(1.0 / temp))

    out = pl.pallas_call(
        kernel,
        out_shape=jax.ShapeDtypeStruct((bx_p, by_p), jnp.float32),
        grid_spec=pltpu.PrefetchScalarGridSpec(
            num_scalar_prefetch=0,
            grid=grid,
            in_specs=[
                pl.BlockSpec((tm, h), lambda i, j: (i, 0)),
                pl.BlockSpec((tn, h), lambda i, j: (j, 0)),
            ],
            out_specs=pl.BlockSpec((tm, tn), lambda i, j: (i, j)),
        ),
        compiler_params=pltpu.CompilerParams(
            dimension_semantics=("parallel", "parallel"),
            vmem_limit_bytes=64 * 1024 * 1024,
        ),
    )(x2d, y2d)

    return out[:bx, :by]


def similarity(x, y, temp):
    """Mirrors Similarity.forward for the standard SimCSE broadcast pattern:
       x: (Bx, 1, H), y: (1, By, H) -> (Bx, By)."""
    assert x.ndim == 3 and y.ndim == 3 and x.shape[1] == 1 and y.shape[0] == 1
    x2d = x[:, 0, :]
    y2d = y[0, :, :]
    return similarity_matrix(x2d, y2d, temp)


if __name__ == "__main__":
    key = jax.random.PRNGKey(0)
    kx, ky = jax.random.split(key)

    B, H = 8, 32
    temp = 0.05

    z1 = jax.random.normal(kx, (B, H), dtype=jnp.float32)
    z2 = jax.random.normal(ky, (B, H), dtype=jnp.float32)

    # Same call pattern as the PyTorch module: x.unsqueeze(1), y.unsqueeze(0)
    x = z1[:, None, :]   # (B, 1, H)
    y = z2[None, :, :]   # (1, B, H)

    out = similarity(x, y, temp)
    out = jax.block_until_ready(out)

    # Pure-JAX reference check.
    xn = z1 / jnp.maximum(jnp.linalg.norm(z1, axis=-1, keepdims=True), _EPS)
    yn = z2 / jnp.maximum(jnp.linalg.norm(z2, axis=-1, keepdims=True), _EPS)
    ref = (xn @ yn.T) / temp
    assert out.shape == ref.shape, "shape mismatch vs reference"
    assert jnp.allclose(out, ref, atol=1e-4, rtol=1e-4), "mismatch vs reference"

    print("KERNEL_OK")
</pallas_src>

<mosaic_0001>
module attributes {stable_mosaic.version = 11 : i64} {
  func.func @_similarity_kernel(%arg0: i32, %arg1: i32, %arg2: memref<8x32xf32, #tpu.memory_space<vmem>>, %arg3: memref<128x32xf32, #tpu.memory_space<vmem>>, %arg4: memref<8x128xf32, #tpu.memory_space<vmem>>) attributes {dimension_semantics = [#tpu.dimension_semantics<parallel>, #tpu.dimension_semantics<parallel>], iteration_bounds = array<i64: 1, 1>, scalar_prefetch = 0 : i64, scratch_operands = 0 : i64, tpu.core_type = #tpu.core_type<tc>, window_params = [{transform_indices = @transform_0, window_bounds = array<i64: 8, 32>}, {transform_indices = @transform_1, window_bounds = array<i64: 128, 32>}, {transform_indices = @transform_2, window_bounds = array<i64: 8, 128>}]} {
    %c0 = arith.constant 0 : index
    %c0_0 = arith.constant 0 : index
    %0 = vector.load %arg2[%c0, %c0_0] : memref<8x32xf32, #tpu.memory_space<vmem>>, vector<8x32xf32>
    %c0_1 = arith.constant 0 : index
    %c0_2 = arith.constant 0 : index
    %1 = vector.load %arg3[%c0_1, %c0_2] : memref<128x32xf32, #tpu.memory_space<vmem>>, vector<128x32xf32>
    %2 = arith.mulf %0, %0 : vector<8x32xf32>
    %cst = arith.constant dense<0.000000e+00> : vector<8xf32>
    %3 = vector.multi_reduction <add>, %2, %cst [1] : vector<8x32xf32> to vector<8xf32>
    %4 = vector.shape_cast %3 : vector<8xf32> to vector<8x1xf32>
    %5 = arith.mulf %1, %1 : vector<128x32xf32>
    %cst_3 = arith.constant dense<0.000000e+00> : vector<128xf32>
    %6 = vector.multi_reduction <add>, %5, %cst_3 [1] : vector<128x32xf32> to vector<128xf32>
    %7 = vector.shape_cast %6 : vector<128xf32> to vector<128x1xf32>
    %cst_4 = arith.constant 1.000000e-16 : f32
    %8 = vector.broadcast %cst_4 : f32 to vector<8x1xf32>
    %9 = arith.maximumf %4, %8 : vector<8x1xf32>
    %10 = math.rsqrt %9 : vector<8x1xf32>
    %cst_5 = arith.constant 2.000000e+01 : f32
    %11 = vector.broadcast %cst_5 : f32 to vector<8x1xf32>
    %12 = arith.mulf %10, %11 : vector<8x1xf32>
    %cst_6 = arith.constant 1.000000e-16 : f32
    %13 = vector.broadcast %cst_6 : f32 to vector<128x1xf32>
    %14 = arith.maximumf %7, %13 : vector<128x1xf32>
    %15 = math.rsqrt %14 : vector<128x1xf32>
    %cst_7 = arith.constant dense<0.000000e+00> : vector<8x128xf32>
    %16 = tpu.matmul %0, %1, %cst_7 {dimension_numbers = #tpu.dot_dimension_numbers<[1], [1], [0], [0], [0, 0, 1, 0], [], []>} : vector<8x32xf32>, vector<128x32xf32>, vector<8x128xf32> -> vector<8x128xf32>
    %17 = vector.broadcast %12 : vector<8x1xf32> to vector<8x128xf32>
    %18 = arith.mulf %16, %17 : vector<8x128xf32>
    %19 = vector.shape_cast %15 : vector<128x1xf32> to vector<1x128xf32>
    %20 = vector.broadcast %19 : vector<1x128xf32> to vector<8x128xf32>
    %21 = arith.mulf %18, %20 : vector<8x128xf32>
    %c0_8 = arith.constant 0 : index
    %c0_9 = arith.constant 0 : index
    %22 = vector.load %arg4[%c0_8, %c0_9] : memref<8x128xf32, #tpu.memory_space<vmem>>, vector<8x128xf32>
    tpu.vector_store %arg4[%c0_8, %c0_9], %21 {strides = array<i32>} : memref<8x128xf32, #tpu.memory_space<vmem>>, vector<8x128xf32>,
    return
  }
  func.func @transform_0(%arg0: i32, %arg1: i32) -> (i32, i32) {
    %c0_i32 = arith.constant 0 : i32
    %c0_i32_0 = arith.constant 0 : i32
    return %arg0, %c0_i32 : i32, i32
  }
  func.func @transform_1(%arg0: i32, %arg1: i32) -> (i32, i32) {
    %c0_i32 = arith.constant 0 : i32
    %c0_i32_0 = arith.constant 0 : i32
    return %arg1, %c0_i32 : i32, i32
  }
  func.func @transform_2(%arg0: i32, %arg1: i32) -> (i32, i32) {
    %c0_i32 = arith.constant 0 : i32
    return %arg0, %arg1 : i32, i32
  }
}

</mosaic_0001>

<bundles_post_ra>
// kernel: tpu_custom_call.1
= control target key start
LH: loop header
LB: loop body
LE: loop exit
PB: predicated region body
PF: predicated region fallthrough
CT: control target
= control target key end

     0   :  { %vm30_vm0 = vcmask 261120   ;;  %s1083_s0 = inlined_call_operand.vmem [shape: f32[8,32], index: 0, kind: input, shape index: {}]   ;;  %s1084_s1 = inlined_call_operand.vmem [shape: f32[128,32], index: 1, kind: input, shape index: {}]   ;;  %s1085_s2 = inlined_call_operand.hbm [shape: f32[8,128], index: 2, kind: output, shape index: {}]  }
   0x1   :  { %v565_v0 = vld [vmem:[%s1084_s1 + $0x78] sm:$0xff]  ;;  %v570_v1 = vld [vmem:[%s1084_s1 + $0x10] sm:$0xff]  ;;  %v575_v2 = vld [vmem:[%s1084_s1] sm:$0xff] }
   0x2   :  { %468 = vmatpush.xpose.msk.msra.mxu0 %vm30_vm0, %v565_v0  ;;  %v36_v3 = vmul.f32 %v570_v1, %v570_v1  ;;  %v34_v4 = vmul.f32 %v575_v2, %v575_v2  ;;  %v586_v5 = vld [vmem:[%s1084_s1 + $0x20] sm:$0xff]  ;;  %v591_v6 = vld [vmem:[%s1084_s1 + $0x70] sm:$0xff]  ;;  %v598_v8 = vld [vmem:[%s1084_s1 + $0x18] sm:$0xff] }
   0x3   :  { %v38_v7 = vmul.f32 %v586_v5, %v586_v5  ;;  %v603_v9 = vld [vmem:[%s1084_s1 + $0x8] sm:$0xff]  ;;  %v37_v14 = vmul.f32 %v598_v8, %v598_v8 }
   0x4   :  { %v56_v10 = vsel %vm30_vm0, %v36_v3, 0.0  ;;  %v50_v11 = vsel %vm30_vm0, %v34_v4, 0.0  ;;  %v18_v12 = vld [vmem:[%s1084_s1 + $0x28] sm:$0xff]  ;;  %v35_v15 = vmul.f32 %v603_v9, %v603_v9 }
   0x5   :  { %57 = vadd.xlane.f32.xlu1 %v56_v10  ;;  %51 = vadd.xlane.f32.xlu0 %v50_v11  ;;  %v62_v13 = vsel %vm30_vm0, %v38_v7, 0.0 }
   0x6   :  { %469 = vmatpush.xpose.msk.msra.mxu0 %vm30_vm0, %v591_v6  ;;  %63 = vadd.xlane.f32.xlu2 %v62_v13 }
   0x7   :  { %7 = vsyncpa [#allocation3], 0  ;;  %v26_v16 = vld [vmem:[%s1084_s1 + $0x68] sm:$0xff]  ;;  %v39_v17 = vmul.f32 %v18_v12, %v18_v12  ;;  %v59_v18 = vsel %vm30_vm0, %v37_v14, 0.0  ;;  %v53_v19 = vsel %vm30_vm0, %v35_v15, 0.0  ;;  %v25_v20 = vld [vmem:[%s1084_s1 + $0x60] sm:$0xff]  ;;  %v49_v47 = vmul.f32 %v565_v0, %v565_v0 }
   0x8   :  { %v20_v22 = vld [vmem:[%s1084_s1 + $0x38] sm:$0xff]  ;;  %v19_v23 = vld [vmem:[%s1084_s1 + $0x30] sm:$0xff]  ;;  %v21_v24 = vld [vmem:[%s1084_s1 + $0x40] sm:$0xff]  ;;  %v47_v41 = vmul.f32 %v26_v16, %v26_v16  ;;  %v46_v42 = vmul.f32 %v25_v20, %v25_v20  ;;  %v48_v48 = vmul.f32 %v591_v6, %v591_v6  ;;  %v374_v60 = vlaneseq  ;;  %s459_s17 = sshll.u32 %s1085_s2, 4  ;;  %s460_s17 = int_to_ptr.hbm [resolvable:$true] %s459_s17 }
   0x9   :  { %v65_v21 = vsel %vm30_vm0, %v39_v17, 0.0  ;;  %v41_v25 = vmul.f32 %v20_v22, %v20_v22  ;;  %v40_v26 = vmul.f32 %v19_v23, %v19_v23  ;;  %v24_v27 = vld [vmem:[%s1084_s1 + $0x58] sm:$0xff]  ;;  %v42_v28 = vmul.f32 %v21_v24, %v21_v24  ;;  %v23_v31 = vld [vmem:[%s1084_s1 + $0x50] sm:$0xff]  ;;  %v22_v33 = vld [vmem:[%s1084_s1 + $0x48] sm:$0xff] }
   0xa   :  { %470 = vmatpush.xpose.msk.msra.mxu0 %vm30_vm0, %v26_v16  ;;  %v44_v34 = vmul.f32 %v23_v31, %v23_v31  ;;  %v43_v35 = vmul.f32 %v22_v33, %v22_v33  ;;  %v45_v36 = vmul.f32 %v24_v27, %v24_v27  ;;  %v12_v40 = vld [vmem:[%s1083_s0] sm:$0xff]  ;;  %v89_v44 = vsel %vm30_vm0, %v47_v41, 0.0  ;;  %s546_s0 = smov [#allocation2]  }
   0xb   :  { %v71_v29 = vsel %vm30_vm0, %v41_v25, 0.0  ;;  %v68_v30 = vsel %vm30_vm0, %v40_v26, 0.0  ;;  %v74_v32 = vsel %vm30_vm0, %v42_v28, 0.0  ;;  %v29_v43 = vmul.f32 %v12_v40, %v12_v40  ;;  %s457_s1 = sshll.u32 %s546_s0, 4  ;;  %s458_s1 = int_to_ptr.vmem [resolvable:$true] %s457_s1 }
   0xc   :  { %v80_v37 = vsel %vm30_vm0, %v44_v34, 0.0  ;;  %v77_v38 = vsel %vm30_vm0, %v43_v35, 0.0  ;;  %v83_v39 = vsel %vm30_vm0, %v45_v36, 0.0  ;;  %v86_v45 = vsel %vm30_vm0, %v46_v42, 0.0 }
   0xd   :  { %60 = vadd.xlane.f32.xlu1 %v59_v18  ;;  %54 = vadd.xlane.f32.xlu0 %v53_v19  ;;  %v31_v46 = vsel %vm30_vm0, %v29_v43, 0.0  ;;  %v95_v49 = vsel %vm30_vm0, %v49_v47, 0.0  ;;  %v92_v50 = vsel %vm30_vm0, %v48_v48, 0.0  ;;  %vm379_vm4 = vcmask 130112  }
   0xe   :  { %471 = vmatpush.xpose.msk.msra.mxu0 %vm30_vm0, %v25_v20  ;;  %66 = vadd.xlane.f32.xlu2 %v65_v21  ;;  %vm383_vm9 = vcmask 195712  }
  0x12   :  { %472 = vmatpush.xpose.msk.msra.mxu0 %vm30_vm0, %v24_v27 }
  0x15   :  { %72 = vadd.xlane.f32.xlu1 %v71_v29  ;;  %69 = vadd.xlane.f32.xlu0 %v68_v30 }
  0x16   :  { %473 = vmatpush.xpose.msk.msra.mxu0 %vm30_vm0, %v23_v31  ;;  %75 = vadd.xlane.f32.xlu2 %v74_v32 }
  0x1a   :  { %474 = vmatpush.xpose.msk.msra.mxu0 %vm30_vm0, %v22_v33 }
  0x1d   :  { %81 = vadd.xlane.f32.xlu1 %v80_v37  ;;  %78 = vadd.xlane.f32.xlu0 %v77_v38 }
  0x1e   :  { %475 = vmatpush.xpose.msk.msra.mxu0 %vm30_vm0, %v21_v24  ;;  %84 = vadd.xlane.f32.xlu2 %v83_v39 }
  0x22   :  { %476 = vmatpush.xpose.msk.msra.mxu0 %vm30_vm0, %v20_v22 }
  0x25   :  { %90 = vadd.xlane.f32.xlu1 %v89_v44  ;;  %87 = vadd.xlane.f32.xlu0 %v86_v45 }
  0x26   :  { %477 = vmatpush.xpose.msk.msra.mxu0 %vm30_vm0, %v19_v23  ;;  %32 = vadd.xlane.f32.xlu2 %v31_v46 }
  0x2a   :  { %478 = vmatpush.xpose.msk.msra.mxu0 %vm30_vm0, %v18_v12 }
  0x2d   :  { %96 = vadd.xlane.f32.xlu1 %v95_v49  ;;  %93 = vadd.xlane.f32.xlu0 %v92_v50 }
  0x2e   :  { %479 = vmatpush.xpose.msk.msra.mxu0 %vm30_vm0, %v586_v5  ;;  %v709_v5 = vand.u32 127, %v374_v60 }
  0x30   :  { %v719_v12 = vadd.s32 4294967280, %v709_v5  ;;  %v726_v18 = vadd.s32 4294967264, %v709_v5  ;;  %v738_v23 = vadd.s32 4294967272, %v709_v5  ;;  %v377_v24 = vadd.s32 4294967288, %v709_v5 }
  0x31   :  { %v742_v25 = vadd.s32 4294967256, %v709_v5  ;;  %v751_v30 = vadd.s32 4294967240, %v709_v5  ;;  %v754_v31 = vadd.s32 4294967248, %v709_v5  ;;  %v757_v32 = vadd.s32 4294967232, %v709_v5 }
  0x32   :  { %480 = vmatpush.xpose.msk.msra.mxu0 %vm30_vm0, %v598_v8 }
  0x36   :  { %481 = vmatpush.xpose.msk.msra.mxu0 %vm30_vm0, %v570_v1 }
  0x3a   :  { %482 = vmatpush.xpose.msk.msra.mxu0 %vm30_vm0, %v603_v9 }
  0x3e   :  { %483 = vmatpush.xpose.msk.msra.mxu0 %vm30_vm0, %v575_v2 }
  0x41   :  { %484 = vmatmul.msk.f32.vlgmr.msra.gmra.mxu0 %vm30_vm0, %v12_v40  ;;  %vm387_vm0 = vcmask 261312  }
  0x78   :  { %v58_v51 = vpop.xlane.xlu1 %57  ;;  %v52_v52 = vpop.xlane.xlu0 %51 }
  0x79   :  { %v682_v53 = vmax.f32 %v58_v51, 1e-16  ;;  %v684_v54 = vmax.f32 %v52_v52, 1e-16  ;;  %v64_v55 = vpop.xlane.xlu2 %63 }
  0x7a   :  { %v686_v56 = vmax.f32 %v64_v55, 1e-16 }
  0x7b   :  { %486 = vrsqrt.f32 %v682_v53  ;;  %vm152_vm1 = vweird.f32 %v682_v53  ;;  %vm132_vm2 = vweird.f32 %v684_v54 }
  0x7c   :  { %488 = vrsqrt.f32 %v684_v54  ;;  %vm172_vm3 = vweird.f32 %v686_v56 }
  0x7d   :  { %490 = vrsqrt.f32 %v686_v56 }
  0x80   :  { %v61_v57 = vpop.xlane.xlu1 %60  ;;  %v55_v58 = vpop.xlane.xlu0 %54 }
  0x81   :  { %v691_v59 = vpop.eup %486  ;;  %v693_v61 = vmax.f32 %v61_v57, 1e-16  ;;  %v695_v62 = vmax.f32 %v55_v58, 1e-16  ;;  %v67_v63 = vpop.xlane.xlu2 %66 }
  0x82   :  { %v697_v0 = vpop.eup %488  ;;  %v147_v1 = vmul.f32 %v691_v59, %v682_v53  ;;  %v704_v3 = vmax.f32 %v67_v63, 1e-16  ;;  %vm153_vm7 = vweird.f32 %v691_v59 }
  0x83   :  { %v127_v2 = vmul.f32 %v697_v0, %v684_v54  ;;  %492 = vrsqrt.f32 %v693_v61  ;;  %v706_v4 = vpop.eup %490  ;;  %vm142_vm5 = vweird.f32 %v695_v62  ;;  %vm133_vm8 = vweird.f32 %v697_v0  ;;  %vm809_vm14 = vmor %vm152_vm1, %vm153_vm7 }
  0x84   :  { %494 = vrsqrt.f32 %v695_v62  ;;  %v148_v6 = vmul.f32 %v691_v59, %v147_v1  ;;  %v167_v8 = vmul.f32 %v706_v4, %v686_v56  ;;  %vm173_vm10 = vweird.f32 %v706_v4  ;;  %vm796_vm13 = vmor %vm132_vm2, %vm133_vm8 }
  0x85   :  { %v128_v7 = vmul.f32 %v697_v0, %v127_v2  ;;  %496 = vrsqrt.f32 %v704_v3  ;;  %vm162_vm11 = vweird.f32 %v693_v61  ;;  %vm182_vm15 = vweird.f32 %v704_v3  ;;  %vm834_vm1 = vmor %vm172_vm3, %vm173_vm10 }
  0x86   :  { %v149_v16 = vmul.f32 0.5, %v148_v6  ;;  %v168_v20 = vmul.f32 %v706_v4, %v167_v8  ;;  %v820_v2 = vadd.s32 4294967216, %v709_v5  ;;  %vm391_vm3 = vcmask 326912  }
  0x87   :  { %v129_v17 = vmul.f32 0.5, %v128_v7  ;;  %vm395_vm8 = vcmask 392512   ;;  %vm399_vm10 = vcmask 458112  }
  0x88   :  { %v73_v9 = vpop.xlane.xlu1 %72  ;;  %v70_v10 = vpop.xlane.xlu0 %69  ;;  %v150_v33 = vsub.f32 1.5, %v149_v16  ;;  %v169_v34 = vmul.f32 0.5, %v168_v20 }
  0x89   :  { %v716_v11 = vpop.eup %492  ;;  %v721_v13 = vmax.f32 %v73_v9, 1e-16  ;;  %v76_v14 = vpop.xlane.xlu2 %75  ;;  %v734_v22 = vmax.f32 %v70_v10, 1e-16  ;;  %v130_v29 = vsub.f32 1.5, %v129_v17  ;;  %v841_v10 = vadd.s32 4294967224, %v709_v5 }
  0x8a   :  { %v723_v15 = vpop.eup %494  ;;  %v157_v19 = vmul.f32 %v716_v11, %v693_v61  ;;  %v764_v37 = vmax.f32 %v76_v14, 1e-16  ;;  %v151_v48 = vmul.f32 %v691_v59, %v150_v33  ;;  %v170_v49 = vsub.f32 1.5, %v169_v34 }
  0x8b   :  { %v137_v21 = vmul.f32 %v723_v15, %v695_v62  ;;  %498 = vrsqrt.f32 %v721_v13  ;;  %v744_v26 = vpop.eup %496  ;;  %vm143_vm6 = vweird.f32 %v723_v15  ;;  %v131_v45 = vmul.f32 %v697_v0, %v130_v29 }
  0x8c   :  { %v158_v27 = vmul.f32 %v716_v11, %v157_v19  ;;  %500 = vrsqrt.f32 %v734_v22  ;;  %v177_v36 = vmul.f32 %v744_v26, %v704_v3  ;;  %vm786_vm12 = vmor %vm142_vm5, %vm143_vm6  ;;  %v155_v53 = vsel %vm809_vm14, %v691_v59, %v151_v48 }
  0x8d   :  { %v138_v28 = vmul.f32 %v723_v15, %v137_v21  ;;  %502 = vrsqrt.f32 %v764_v37  ;;  %v135_v54 = vsel %vm796_vm13, %v697_v0, %v131_v45  ;;  %v826_v6 = vmul.f32 %v706_v4, %v170_v49 }
  0x8e   :  { %v159_v41 = vmul.f32 0.5, %v158_v27  ;;  %v178_v52 = vmul.f32 %v744_v26, %v177_v36  ;;  %vm163_vm2 = vweird.f32 %v716_v11  ;;  %v376_v16 = vperm.slane %v135_v54, %v709_v5 }
  0x8f   :  { %v139_v35 = vmul.f32 0.5, %v138_v28  ;;  %v382_v20 = vperm.slane %v155_v53, %v719_v12  ;;  %v175_v29 = vsel %vm834_vm1, %v706_v4, %v826_v6  ;;  %vm183_vm5 = vweird.f32 %v744_v26  ;;  %vm869_vm6 = vmor %vm162_vm11, %vm163_vm2 }
  0x90   :  { %v82_v38 = vpop.xlane.xlu1 %81  ;;  %v79_v39 = vpop.xlane.xlu0 %78  ;;  %v160_v58 = vsub.f32 1.5, %v159_v41  ;;  %v179_v9 = vmul.f32 0.5, %v178_v52  ;;  %vm192_vm7 = vweird.f32 %v734_v22  ;;  %vm901_vm11 = vmor %vm182_vm15, %vm183_vm5  ;;  %vm403_vm14 = vcmask 523712  }
  0x91   :  { %v766_v40 = vpop.eup %498  ;;  %v140_v42 = vsub.f32 1.5, %v139_v35  ;;  %v768_v43 = vmax.f32 %v82_v38, 1e-16  ;;  %v770_v44 = vmax.f32 %v79_v39, 1e-16  ;;  %v85_v47 = vpop.xlane.xlu2 %84  ;;  %v390_v6 = vperm.slane %v175_v29, %v726_v18 }
  0x92   :  { %v197_v46 = vmul.f32 %v766_v40, %v721_v13  ;;  %v792_v55 = vpop.eup %500  ;;  %v828_v8 = vmax.f32 %v85_v47, 1e-16  ;;  %v161_v17 = vmul.f32 %v716_v11, %v160_v58  ;;  %v180_v35 = vsub.f32 1.5, %v179_v9 }
  0x93   :  { %v141_v50 = vmul.f32 %v723_v15, %v140_v42  ;;  %504 = vrsqrt.f32 %v768_v43  ;;  %v187_v1 = vmul.f32 %v792_v55, %v734_v22  ;;  %vm212_vm15 = vweird.f32 %v764_v37 }
  0x94   :  { %v198_v62 = vmul.f32 %v766_v40, %v197_v46  ;;  %506 = vrsqrt.f32 %v770_v44  ;;  %v165_v41 = vsel %vm869_vm6, %v716_v11, %v161_v17  ;;  %v181_v57 = vmul.f32 %v744_v26, %v180_v35 }
  0x95   :  { %v145_v60 = vsel %vm786_vm12, %v723_v15, %v141_v50  ;;  %v188_v59 = vmul.f32 %v792_v55, %v187_v1  ;;  %v843_v15 = vpop.eup %502  ;;  %508 = vrsqrt.f32 %v828_v8  ;;  %v386_v52 = vperm.slane %v165_v41, %v738_v23 }
  0x96   :  { %v378_v7 = vperm.slane %v145_v60, %v377_v24  ;;  %v199_v56 = vmul.f32 0.5, %v198_v62  ;;  %v207_v24 = vmul.f32 %v843_v15, %v764_v37  ;;  %vm203_vm12 = vweird.f32 %v766_v40 }
  0x97   :  { %v189_v21 = vmul.f32 0.5, %v188_v59  ;;  %v185_v9 = vsel %vm901_vm11, %v744_v26, %v181_v57  ;;  %vm213_vm1 = vweird.f32 %v843_v15  ;;  %vm232_vm2 = vweird.f32 %v768_v43 }
  0x98   :  { %v91_v14 = vpop.xlane.xlu1 %90  ;;  %v380_v33 = vsel %vm379_vm4, %v378_v7, %v376_v16  ;;  %v208_v4 = vmul.f32 %v843_v15, %v207_v24  ;;  %v88_v38 = vpop.xlane.xlu0 %87  ;;  %v200_v42 = vsub.f32 1.5, %v199_v56  ;;  %vm193_vm4 = vweird.f32 %v792_v55  ;;  %vm957_vm5 = vmor %vm212_vm15, %vm213_vm1 }
  0x99   :  { %v848_v19 = vpop.eup %504  ;;  %v853_v27 = vmax.f32 %v91_v14, 1e-16  ;;  %v190_v36 = vsub.f32 1.5, %v189_v21  ;;  %v33_v39 = vpop.xlane.xlu2 %32  ;;  %v384_v45 = vsel %vm383_vm9, %v382_v20, %v380_v33  ;;  %v888_v50 = vmax.f32 %v88_v38, 1e-16  ;;  %vm913_vm13 = vmor %vm192_vm7, %vm193_vm4 }
  0x9a   :  { %v855_v28 = vpop.eup %506  ;;  %v227_v12 = vmul.f32 %v848_v19, %v768_v43  ;;  %v209_v46 = vmul.f32 0.5, %v208_v4  ;;  %v890_v51 = vmax.f32 %v33_v39, 1e-16  ;;  %vm202_vm9 = vweird.f32 %v721_v13 }
  0x9b   :  { %v217_v61 = vmul.f32 %v855_v28, %v770_v44  ;;  %510 = vrsqrt.f32 %v853_v27  ;;  %v884_v48 = vpop.eup %508  ;;  %v191_v49 = vmul.f32 %v792_v55, %v190_v36  ;;  %v201_v62 = vmul.f32 %v766_v40, %v200_v42 }
  0x9c   :  { %v228_v47 = vmul.f32 %v848_v19, %v227_v12  ;;  %v237_v58 = vmul.f32 %v884_v48, %v828_v8  ;;  %512 = vrsqrt.f32 %v888_v50  ;;  %v388_v54 = vsel %vm387_vm0, %v386_v52, %v384_v45  ;;  %vm933_vm0 = vmor %vm202_vm9, %vm203_vm12 }
  0x9d   :  { %v218_v11 = vmul.f32 %v855_v28, %v217_v61  ;;  %v210_v1 = vsub.f32 1.5, %v209_v46  ;;  %514 = vrsqrt.f32 %v890_v51  ;;  %v195_v7 = vsel %vm913_vm13, %v792_v55, %v191_v49 }
  0x9e   :  { %v229_v53 = vmul.f32 0.5, %v228_v47  ;;  %v238_v0 = vmul.f32 %v884_v48, %v237_v58  ;;  %v392_v14 = vsel %vm391_vm3, %v390_v6, %v388_v54  ;;  %v205_v16 = vsel %vm933_vm0, %v766_v40, %v201_v62 }
  0x9f   :  { %v219_v23 = vmul.f32 0.5, %v218_v11  ;;  %v398_v26 = vperm.slane %v195_v7, %v754_v31  ;;  %v211_v17 = vmul.f32 %v843_v15, %v210_v1  ;;  %v394_v24 = vperm.slane %v185_v9, %v742_v25 }
  0xa0   :  { %v97_v63 = vpop.xlane.xlu1 %96  ;;  %v230_v56 = vsub.f32 1.5, %v229_v53  ;;  %v94_v20 = vpop.xlane.xlu0 %93  ;;  %vm407_vm3 = vcmask 589312   ;;  %vm222_vm6 = vweird.f32 %v770_v44  ;;  %v239_v31 = vmul.f32 0.5, %v238_v0 }
  0xa1   :  { %v924_v22 = vpop.eup %510  ;;  %v220_v55 = vsub.f32 1.5, %v219_v23  ;;  %v938_v59 = vmax.f32 %v97_v63, 1e-16  ;;  %vm233_vm7 = vweird.f32 %v848_v19  ;;  %vm223_vm4 = vweird.f32 %v855_v28 }
  0xa2   :  { %v257_v13 = vmul.f32 %v924_v22, %v853_v27  ;;  %v950_v21 = vpop.eup %512  ;;  %v396_v12 = vsel %vm395_vm8, %v394_v24, %v392_v14  ;;  %v402_v34 = vperm.slane %v205_v16, %v751_v30  ;;  %v974_v36 = vmax.f32 %v94_v20, 1e-16  ;;  %vm984_vm8 = vmor %vm222_vm6, %vm223_vm4 }
  0xa3   :  { %516 = vrsqrt.f32 %v938_v59  ;;  %v963_v33 = vpop.eup %514  ;;  %v221_v25 = vmul.f32 %v855_v28, %v220_v55  ;;  %v247_v37 = vmul.f32 %v950_v21, %v888_v50  ;;  %v400_v4 = vsel %vm399_vm10, %v398_v26, %v396_v12  ;;  %vm1001_vm9 = vmor %vm232_vm2, %vm233_vm7 }
  0xa4   :  { %v258_v29 = vmul.f32 %v924_v22, %v257_v13  ;;  %v100_v35 = vmul.f32 %v963_v33, %v890_v51  ;;  %v215_v38 = vsel %vm957_vm5, %v843_v15, %v211_v17  ;;  %v231_v39 = vmul.f32 %v848_v19, %v230_v56 }
  0xa5   :  { %v248_v41 = vmul.f32 %v950_v21, %v247_v37  ;;  %v240_v30 = vsub.f32 1.5, %v239_v31  ;;  %518 = vrsqrt.f32 %v974_v36  ;;  %vm411_vm10 = vcmask 654912  }
  0xa6   :  { %v259_v61 = vmul.f32 0.5, %v258_v29  ;;  %v101_v45 = vmul.f32 %v963_v33, %v100_v35  ;;  %v225_v15 = vsel %vm984_vm8, %v855_v28, %v221_v25  ;;  %v417_v47 = vadd.s32 4294967208, %v709_v5 }
  0xa7   :  { %v249_v44 = vmul.f32 0.5, %v248_v41  ;;  %v404_v49 = vsel %vm403_vm14, %v402_v34, %v400_v4  ;;  %vm242_vm11 = vweird.f32 %v828_v8  ;;  %vm243_vm12 = vweird.f32 %v884_v48 }
  0xa8   :  { %v406_v52 = vperm.slane %v215_v38, %v757_v32  ;;  %v235_v57 = vsel %vm1001_vm9, %v848_v19, %v231_v39  ;;  %v102_v60 = vmul.f32 0.5, %v101_v45  ;;  %v410_v43 = vperm.slane %v225_v15, %v841_v10  ;;  %vm1016_vm13 = vmor %vm242_vm11, %vm243_vm12 }
  0xa9   :  { %v990_v46 = vpop.eup %516  ;;  %v250_v58 = vsub.f32 1.5, %v249_v44  ;;  %v241_v62 = vmul.f32 %v884_v48, %v240_v30  ;;  %v260_v23 = vsub.f32 1.5, %v259_v61  ;;  %v421_v54 = vadd.s32 4294967200, %v709_v5 }
  0xaa   :  { %v277_v28 = vmul.f32 %v990_v46, %v938_v59  ;;  %vm252_vm14 = vweird.f32 %v888_v50  ;;  %vm253_vm15 = vweird.f32 %v950_v21  ;;  %v414_v10 = vperm.slane %v235_v57, %v820_v2 }
  0xab   :  { %v251_v32 = vmul.f32 %v950_v21, %v250_v58  ;;  %v519_v19 = vpop.eup %518  ;;  %vm262_vm0 = vweird.f32 %v853_v27  ;;  %vm105_vm1 = vweird.f32 %v890_v51  ;;  %v408_v1 = vsel %vm407_vm3, %v406_v52, %v404_v49  ;;  %vm1035_vm5 = vmor %vm252_vm14, %vm253_vm15 }
  0xac   :  { %v278_v8 = vmul.f32 %v990_v46, %v277_v28  ;;  %vm263_vm2 = vweird.f32 %v924_v22  ;;  %v103_v53 = vsub.f32 1.5, %v102_v60  ;;  %v267_v6 = vmul.f32 %v519_v19, %v974_v36 }
  0xad   :  { %v412_v7 = vsel %vm411_vm10, %v410_v43, %v408_v1  ;;  %v245_v50 = vsel %vm1016_vm13, %v884_v48, %v241_v62  ;;  %v261_v2 = vmul.f32 %v924_v22, %v260_v23  ;;  %v255_v18 = vsel %vm1035_vm5, %v950_v21, %v251_v32  ;;  %vm1051_vm8 = vmor %vm262_vm0, %vm263_vm2 }
  0xae   :  { %v279_v3 = vmul.f32 0.5, %v278_v8  ;;  %v268_v55 = vmul.f32 %v519_v19, %v267_v6  ;;  %vm106_vm3 = vweird.f32 %v963_v33  ;;  %vm415_vm6 = vcmask 720512  }
  0xaf   :  { %v425_v14 = vadd.s32 4294967192, %v709_v5  ;;  %vm282_vm7 = vweird.f32 %v938_v59  ;;  %vm283_vm4 = vweird.f32 %v990_v46  ;;  %v418_v48 = vperm.slane %v245_v50, %v417_v47  ;;  %vm1062_vm9 = vmor %vm105_vm1, %vm106_vm3 }
  0xb0   :  { %v280_v9 = vsub.f32 1.5, %v279_v3  ;;  %v269_v26 = vmul.f32 0.5, %v268_v55  ;;  %vm272_vm10 = vweird.f32 %v974_v36  ;;  %v104_v17 = vmul.f32 %v963_v33, %v103_v53  ;;  %vm1066_vm12 = vmor %vm282_vm7, %vm283_vm4 }
  0xb1   :  { %v265_v59 = vsel %vm1051_vm8, %v924_v22, %v261_v2  ;;  %v422_v56 = vperm.slane %v255_v18, %v421_v54  ;;  %v416_v27 = vsel %vm415_vm6, %v414_v10, %v412_v7  ;;  %vm419_vm11 = vcmask 786112  }
  0xb2   :  { %v281_v16 = vmul.f32 %v990_v46, %v280_v9  ;;  %v270_v24 = vsub.f32 1.5, %v269_v26  ;;  %vm273_vm13 = vweird.f32 %v519_v19  ;;  %vm423_vm14 = vcmask 851712  }
  0xb3   :  { %v433_v40 = vadd.s32 4294967176, %v709_v5  ;;  %v429_v51 = vadd.s32 4294967184, %v709_v5  ;;  %v426_v31 = vperm.slane %v265_v59, %v425_v14  ;;  %v108_v25 = vsel %vm1062_vm9, %v963_v33, %v104_v17  ;;  %vm274_vm15 = vmor %vm272_vm10, %vm273_vm13 }
  0xb4   :  { %v285_v22 = vsel %vm1066_vm12, %v990_v46, %v281_v16  ;;  %v271_v29 = vmul.f32 %v519_v19, %v270_v24  ;;  %v420_v37 = vsel %vm419_vm11, %v418_v48, %v416_v27  ;;  %vm427_vm0 = vcmask 917312  }
  0xb5   :  { %v424_v12 = vsel %vm423_vm14, %v422_v56, %v420_v37  ;;  %vm431_vm1 = vcmask 982912   ;;  %v434_v35 = vperm.slane %v285_v22, %v433_v40  ;;  %v109_v38 = vmul.f32 20.0, %v108_v25 }
  0xb6   :  { %v275_v34 = vsel %vm274_vm15, %v519_v19, %v271_v29  ;;  %vm435_vm2 = vcmask 1048512   ;;  %v428_v5 = vsel %vm427_vm0, %v426_v31, %v424_v12 }
  0xb7   :  { %v430_v4 = vperm.slane %v275_v34, %v429_v51 }
  0xb9   :  { %v432_v41 = vsel %vm431_vm1, %v430_v4, %v428_v5 }
  0xba   :  { %v436_v36 = vsel %vm435_vm2, %v434_v35, %v432_v41 }
  0xbe   :  { %v354_v39 = vpop.f32.mrf.mxu0 }
  0xbf   :  { %v357_v33 = vmul.f32 %v354_v39, %v109_v38 }
  0xc1   :  { %v450_v42 = vmul.f32 %v436_v36, %v357_v33 }
  0xc3   :  { %451 = vst [vmem:[#allocation2] sm:$0xff] %v450_v42 }
  0xc4   :  { %462 = dma.vmem_to_hbm [thread:$0]  %s458_s1, 128, %s460_s17, [#allocation3]  }
  0xc5   :  { %544 = dma.done.wait [#allocation3], 128  }
  0xc6   :  { %545 = vsyncadd [#allocation3], 4294967168 }
  0xc7   :  { %467 = vsyncpa [#allocation3], 1 }

</bundles_post_ra>
